<compile_context>
chip_gen: v6e
topology: v6e:2x2x1
jax: 0.10.0
libtpu: 0.0.40
codegen_flags: <defaults>
</compile_context>

<pallas_src>
import functools

import jax
import jax.numpy as jnp
from jax import lax
from jax.experimental import pallas as pl
from jax.experimental.pallas import tpu as pltpu


def _round_up(x, m):
    return ((x + m - 1) // m) * m


def _pad_to(a, shape):
    return jnp.pad(a, [(0, t - s) for s, t in zip(a.shape, shape)])


def _vmem_capacity_bytes():
    """Physical VMEM per TensorCore (generation-aware)."""
    try:
        return int(pltpu.get_tpu_info().vmem_capacity_bytes)
    except Exception:
        return 64 << 20  # conservative fallback (v7x per-TC VMEM)


# --------------------------------------------------------------------------------------
# Kernels
# --------------------------------------------------------------------------------------
def _mlp_resident_kernel(num_hidden_layers, *refs):
    """One batch tile of the MLP; all weights resident in VMEM.

    refs (L>0): x (TILE_B, IN_P), w_in (IN_P, H_P), b_in (1, H_P) f32,
                w_hid (L, H_P, H_P), b_hid (L, 1, H_P) f32,
                w_out (1, H_P) f32, b_out (1, 1) f32, o (1, 1, TILE_B) f32
    refs (L=0): same without w_hid / b_hid.
    """
    if num_hidden_layers > 0:
        (x_ref, w_in_ref, b_in_ref, w_hid_ref, b_hid_ref,
         w_out_ref, b_out_ref, o_ref) = refs
    else:
        (x_ref, w_in_ref, b_in_ref, w_out_ref, b_out_ref, o_ref) = refs
        w_hid_ref = b_hid_ref = None

    xv = x_ref[...]
    if xv.dtype != w_in_ref.dtype:      # in-kernel cast: avoids a wrapper-side HBM pass
        xv = xv.astype(w_in_ref.dtype)

    # Input layer + ReLU (MXU matmul, f32 accumulation).
    h = jnp.dot(xv, w_in_ref[...], preferred_element_type=jnp.float32)
    h = jnp.maximum(h + b_in_ref[...], 0.0)

    if num_hidden_layers >= 8:
        # Many layers: fori_loop keeps one layer's weights/activation live at a time.
        def body(l, h):
            w = w_hid_ref[l]                               # dynamic leading-axis index
            hh = jnp.dot(h.astype(w.dtype), w, preferred_element_type=jnp.float32)
            return jnp.maximum(hh + b_hid_ref[l], 0.0)
        h = lax.fori_loop(0, num_hidden_layers, body, h, unroll=2)
    else:
        for l in range(num_hidden_layers):                 # small static L: keep unrolled
            hh = jnp.dot(h.astype(w_hid_ref.dtype), w_hid_ref[l],
                         preferred_element_type=jnp.float32)
            h = jnp.maximum(hh + b_hid_ref[l], 0.0)

    # Output layer as a feature contraction emitting a lane-dense (1, TILE_B) row
    # (avoids an XLU transpose and 1-lane masked stores).  FLOPs ~ 1/H_P of one layer.
    out_row = lax.dot_general(w_out_ref[...], h, (((1,), (1,)), ((), ())),
                              preferred_element_type=jnp.float32)
    o_ref[...] = (out_row.reshape(o_ref.shape) + b_out_ref[...]).astype(o_ref.dtype)


def _mlp_stream_kernel(num_hidden_layers,
                       x_ref, w_in_ref, b_in_ref, w_hid_ref, b_hid_ref,
                       w_out_ref, b_out_ref, o_ref, h_ref):
    """Layer-streaming variant: grid = (batch_tiles, L), one hidden-weight slab per step.

    w_hid_ref : (1, H_P, H_P) streamed (double-buffered by the BlockSpec pipeliner)
    h_ref     : (TILE_B, H_P) f32 VMEM scratch, carries the activation across layer steps
    o_ref     : (1, 1, TILE_B) f32, written only at the last layer step (accumulator spec)
    """
    l = pl.program_id(1)

    @pl.when(l == 0)
    def _():
        xv = x_ref[...]
        if xv.dtype != w_in_ref.dtype:
            xv = xv.astype(w_in_ref.dtype)
        h0 = jnp.dot(xv, w_in_ref[...], preferred_element_type=jnp.float32)
        h_ref[...] = jnp.maximum(h0 + b_in_ref[...], 0.0)

    h = jnp.dot(h_ref[...].astype(w_hid_ref.dtype), w_hid_ref[0],
                preferred_element_type=jnp.float32)
    h_ref[...] = jnp.maximum(h + b_hid_ref[0], 0.0)

    @pl.when(l == pl.num_programs(1) - 1)
    def _():
        out_row = lax.dot_general(w_out_ref[...], h_ref[...], (((1,), (1,)), ((), ())),
                                  preferred_element_type=jnp.float32)
        o_ref[...] = (out_row.reshape(o_ref.shape) + b_out_ref[...]).astype(o_ref.dtype)


# --------------------------------------------------------------------------------------
# Wrapper
# --------------------------------------------------------------------------------------
def nn_model_forward(x, params, num_hidden_layers, *,
                     tile_b=None, compute_dtype=jnp.float32, force_stream=False):
    """Pallas forward for NNModel: x (B, num_inputs) -> (B, 1).

    compute_dtype=jnp.bfloat16 halves weight/x DMA traffic on v5e/v6e/v7x (MXU is bf16
    native on all three); accumulation and bias/ReLU stay f32.
    """
    w_in, b_in, w_hid, b_hid, w_out, b_out = params
    B, num_inputs = x.shape
    H = w_in.shape[1]
    L = int(num_hidden_layers)

    cdt = jnp.dtype(compute_dtype)
    in_p = _round_up(num_inputs, 128)
    h_p = _round_up(H, 128)

    # ----- padded / sliced parameters (only the layers actually used) ------------------
    w_in_p = _pad_to(w_in, (in_p, h_p)).astype(cdt)
    b_in_p = _pad_to(b_in.reshape(1, -1), (1, h_p)).astype(jnp.float32)
    if L > 0:
        w_hid_p = _pad_to(w_hid[:L], (L, h_p, h_p)).astype(cdt)
        b_hid_p = _pad_to(b_hid[:L].reshape(L, 1, -1), (L, 1, h_p)).astype(jnp.float32)
    else:
        w_hid_p = b_hid_p = None
    w_out_p = _pad_to(w_out, (h_p, 1)).T.astype(jnp.float32)     # (1, H_P) row
    b_out_p = b_out.reshape(1, 1).astype(jnp.float32)

    # ----- VMEM budgeting (generation-aware; counts default 2-deep weight buffering) ---
    vmem_cap = _vmem_capacity_bytes()
    vmem_budget = int(0.87 * vmem_cap)           # ~110 MiB on v5e/v6e, ~56 MiB on v7x

    def nbytes(a):
        return 0 if a is None else int(a.nbytes)

    small_w = nbytes(w_in_p) + nbytes(b_in_p) + nbytes(w_out_p) + nbytes(b_out_p)
    hid_w_all = nbytes(w_hid_p) + nbytes(b_hid_p)
    hid_w_one = hid_w_all // L if L > 0 else 0
    resident_w = 2 * (small_w + hid_w_all)       # x2: pipeliner double-buffers each input
    stream_w = 2 * (small_w + hid_w_one)         # only one hidden slab resident at a time

    x_itemsize = max(jnp.dtype(x.dtype).itemsize, cdt.itemsize)

    def act_bytes(t, streaming):
        b = (2 * t * in_p * x_itemsize           # double-buffered x tiles
             + 2 * t * 4                         # double-buffered (1, 1, t) output rows
             + 4 * t * h_p * 4)                  # live f32 activations / temps
        if streaming:
            b += t * h_p * 4                     # carried-activation VMEM scratch
        return b

    # Stream hidden weights per layer once 2x resident weights stop fitting comfortably
    # (v7x: ~48 MiB of its 64 MiB VMEM).
    use_stream = bool(L > 0 and (force_stream or
                                 resident_w + act_bytes(256, False) > int(0.75 * vmem_cap)))
    w_budget = stream_w if use_stream else resident_w

    # ----- batch tile selection ---------------------------------------------------------
    if tile_b is None:
        tile_b = min(2048, _round_up(B, 128))    # big tiles amortize ~0.35 us per grid step
    tile_b = max(128, _round_up(tile_b, 128))    # lane-dense output rows
    while tile_b > 128 and w_budget + act_bytes(tile_b, use_stream) > int(0.9 * vmem_budget):
        tile_b = _round_up(tile_b // 2, 128)     # stay inside the VMEM budget
    while tile_b > 128 and _round_up(B, tile_b) // tile_b < 2:
        tile_b = _round_up(tile_b // 2, 128)     # >= 2 blocks so v7x megacore has work
    n_blk = _round_up(B, tile_b) // tile_b
    if n_blk > 1 and n_blk % 2 == 1 and tile_b > 128:
        cand = _round_up(tile_b // 2, 128)       # prefer an even block count (2 TCs)
        if (_round_up(B, cand) // cand) % 2 == 0:
            tile_b = cand
    b_pad = _round_up(B, tile_b)
    n_blk = b_pad // tile_b

    vmem_limit = min(vmem_budget,
                     max(16 << 20,
                         int(1.25 * (w_budget + act_bytes(tile_b, use_stream))) + (2 << 20)))

    # ----- input: skip the wrapper-side pad/cast HBM pass when x is already aligned -----
    if x.shape == (b_pad, in_p):
        x_in = x                                  # zero-copy; any cast happens in-kernel
    else:
        x_in = _pad_to(x, (b_pad, in_p)).astype(cdt)

    out_shape = jax.ShapeDtypeStruct((n_blk, 1, tile_b), jnp.float32)

    if not use_stream:
        operands = [x_in, w_in_p, b_in_p]
        in_specs = [
            pl.BlockSpec((tile_b, in_p), lambda i: (i, 0)),          # x: streamed
            pl.BlockSpec((in_p, h_p), lambda i: (0, 0)),             # weights: resident
            pl.BlockSpec((1, h_p), lambda i: (0, 0)),
        ]
        if L > 0:
            operands += [w_hid_p, b_hid_p]
            in_specs += [
                pl.BlockSpec((L, h_p, h_p), lambda i: (0, 0, 0)),
                pl.BlockSpec((L, 1, h_p), lambda i: (0, 0, 0)),
            ]
        operands += [w_out_p, b_out_p]
        in_specs += [
            pl.BlockSpec((1, h_p), lambda i: (0, 0)),
            pl.BlockSpec((1, 1), lambda i: (0, 0)),
        ]
        out_slab = pl.pallas_call(
            functools.partial(_mlp_resident_kernel, L),
            out_shape=out_shape,
            grid_spec=pltpu.PrefetchScalarGridSpec(
                num_scalar_prefetch=0,
                grid=(n_blk,),
                in_specs=in_specs,
                out_specs=pl.BlockSpec((1, 1, tile_b), lambda i: (i, 0, 0)),
            ),
            compiler_params=pltpu.CompilerParams(
                dimension_semantics=("parallel",),
                vmem_limit_bytes=vmem_limit,
            ),
        )(*operands)
    else:
        out_slab = pl.pallas_call(
            functools.partial(_mlp_stream_kernel, L),
            out_shape=out_shape,
            grid_spec=pltpu.PrefetchScalarGridSpec(
                num_scalar_prefetch=0,
                grid=(n_blk, L),                                      # layer axis innermost
                in_specs=[
                    pl.BlockSpec((tile_b, in_p), lambda i, l: (i, 0)),
                    pl.BlockSpec((in_p, h_p), lambda i, l: (0, 0)),
                    pl.BlockSpec((1, h_p), lambda i, l: (0, 0)),
                    pl.BlockSpec((1, h_p, h_p), lambda i, l: (l, 0, 0)),  # streamed slab
                    pl.BlockSpec((1, 1, h_p), lambda i, l: (l, 0, 0)),
                    pl.BlockSpec((1, h_p), lambda i, l: (0, 0)),
                    pl.BlockSpec((1, 1), lambda i, l: (0, 0)),
                ],
                out_specs=pl.BlockSpec((1, 1, tile_b), lambda i, l: (i, 0, 0)),
                scratch_shapes=[pltpu.VMEM((tile_b, h_p), jnp.float32)],
            ),
            compiler_params=pltpu.CompilerParams(
                dimension_semantics=("parallel", "arbitrary"),
                vmem_limit_bytes=vmem_limit,
            ),
        )(x_in, w_in_p, b_in_p, w_hid_p, b_hid_p, w_out_p, b_out_p)

    # (n_blk, 1, TILE_B) row-major flatten == global batch order; drop batch padding.
    return out_slab.reshape(-1)[:B, None]


# --------------------------------------------------------------------------------------
# Reference + synthetic params
# --------------------------------------------------------------------------------------
def init_params(key, num_inputs, num_hidden_layers, num_inner_features):
    """Deterministic synthetic parameters (shapes match nn.Linear layers, transposed)."""
    ks = jax.random.split(key, 6)
    H = num_inner_features
    La = max(num_hidden_layers, 1)
    w_in = jax.random.normal(ks[0], (num_inputs, H), jnp.float32) * 0.1
    b_in = jax.random.normal(ks[1], (1, H), jnp.float32) * 0.1
    w_hid = jax.random.normal(ks[2], (La, H, H), jnp.float32) * 0.1
    b_hid = jax.random.normal(ks[3], (La, 1, H), jnp.float32) * 0.1
    w_out = jax.random.normal(ks[4], (H, 1), jnp.float32) * 0.1
    b_out = jax.random.normal(ks[5], (1, 1), jnp.float32) * 0.1
    return w_in, b_in, w_hid, b_hid, w_out, b_out


def reference_forward(x, params, num_hidden_layers):
    """Pure-JAX reference (mirrors the PyTorch forward)."""
    w_in, b_in, w_hid, b_hid, w_out, b_out = params
    h = jnp.maximum(x @ w_in + b_in, 0.0)
    for l in range(num_hidden_layers):
        h = jnp.maximum(h @ w_hid[l] + b_hid[l], 0.0)
    return h @ w_out + b_out


if __name__ == "__main__":
    key = jax.random.PRNGKey(0)

    def run_case(batch, num_inputs, L, H, atol, rtol, **kw):
        kx, kp = jax.random.split(jax.random.fold_in(key, 7919 * batch + 31 * L + H))
        x = jax.random.normal(kx, (batch, num_inputs), jnp.float32)
        params = init_params(kp, num_inputs, L, H)
        out = jax.block_until_ready(nn_model_forward(x, params, L, **kw))
        ref = reference_forward(x, params, L)
        assert out.shape == (batch, 1), out.shape
        assert jnp.allclose(out, ref, atol=atol, rtol=rtol), (out, ref)

    # 1) Base config (f32, resident weights): exact match.
    run_case(8, 32, 2, 64, atol=1e-5, rtol=1e-4)
    # 2) bf16 compute (weights/x in bf16, f32 accumulation) — valid on v5e/v6e/v7x.
    run_case(8, 32, 2, 64, atol=1e-1, rtol=1e-1, compute_dtype=jnp.bfloat16)
    # 3) Layer-streaming path (forced): grid = (batch_tiles, L), w_hid streamed per layer.
    run_case(8, 32, 2, 64, atol=1e-5, rtol=1e-4, force_stream=True)
    # 4) No hidden layers: hidden weights are not passed / DMA'd at all.
    run_case(8, 32, 0, 64, atol=1e-5, rtol=1e-4)
    # 5) Aligned input (zero-copy x, in-kernel bf16 cast) + >= 2 grid blocks for megacore.
    run_case(256, 128, 1, 128, atol=1e-1, rtol=1e-1, compute_dtype=jnp.bfloat16)
    # 6) Many layers: lax.fori_loop path with dynamic w_hid_ref[l] indexing.
    run_case(8, 32, 8, 32, atol=1e-5, rtol=1e-4)

    print("KERNEL_OK")
</pallas_src>

<mosaic_0001>
module attributes {stable_mosaic.version = 11 : i64} {
  func.func @_mlp_resident_kernel(%arg0: i32, %arg1: memref<128x128xf32, #tpu.memory_space<vmem>>, %arg2: memref<128x128xf32, #tpu.memory_space<vmem>>, %arg3: memref<1x128xf32, #tpu.memory_space<vmem>>, %arg4: memref<2x128x128xf32, #tpu.memory_space<vmem>>, %arg5: memref<2x1x128xf32, #tpu.memory_space<vmem>>, %arg6: memref<1x128xf32, #tpu.memory_space<vmem>>, %arg7: memref<1x1xf32, #tpu.memory_space<vmem>>, %arg8: memref<1x1x128xf32, #tpu.memory_space<vmem>>) attributes {dimension_semantics = [#tpu.dimension_semantics<parallel>], iteration_bounds = array<i64: 1>, scalar_prefetch = 0 : i64, scratch_operands = 0 : i64, tpu.core_type = #tpu.core_type<tc>, window_params = [{transform_indices = @transform_0, window_bounds = array<i64: 128, 128>}, {pipeline_mode = #tpu.pipeline_mode<synchronous>, transform_indices = @transform_1, window_bounds = array<i64: 128, 128>}, {pipeline_mode = #tpu.pipeline_mode<synchronous>, transform_indices = @transform_2, window_bounds = array<i64: 1, 128>}, {pipeline_mode = #tpu.pipeline_mode<synchronous>, transform_indices = @transform_3, window_bounds = array<i64: 2, 128, 128>}, {pipeline_mode = #tpu.pipeline_mode<synchronous>, transform_indices = @transform_4, window_bounds = array<i64: 2, 1, 128>}, {pipeline_mode = #tpu.pipeline_mode<synchronous>, transform_indices = @transform_5, window_bounds = array<i64: 1, 128>}, {pipeline_mode = #tpu.pipeline_mode<synchronous>, transform_indices = @transform_6, window_bounds = array<i64: 1, 1>}, {transform_indices = @transform_7, window_bounds = array<i64: 1, 1, 128>}]} {
    %c0 = arith.constant 0 : index
    %c0_0 = arith.constant 0 : index
    %0 = vector.load %arg1[%c0, %c0_0] : memref<128x128xf32, #tpu.memory_space<vmem>>, vector<128x128xf32>
    %c0_1 = arith.constant 0 : index
    %c0_2 = arith.constant 0 : index
    %1 = vector.load %arg2[%c0_1, %c0_2] : memref<128x128xf32, #tpu.memory_space<vmem>>, vector<128x128xf32>
    %cst = arith.constant dense<0.000000e+00> : vector<128x128xf32>
    %2 = tpu.matmul %0, %1, %cst {dimension_numbers = #tpu.dot_dimension_numbers<[1], [0], [0], [1], [0, 0, 1, 1], [], []>} : vector<128x128xf32>, vector<128x128xf32>, vector<128x128xf32> -> vector<128x128xf32>
    %c0_3 = arith.constant 0 : index
    %c0_4 = arith.constant 0 : index
    %3 = vector.load %arg3[%c0_3, %c0_4] : memref<1x128xf32, #tpu.memory_space<vmem>>, vector<1x128xf32>
    %4 = vector.broadcast %3 : vector<1x128xf32> to vector<128x128xf32>
    %5 = arith.addf %2, %4 : vector<128x128xf32>
    %cst_5 = arith.constant 0.000000e+00 : f32
    %6 = vector.broadcast %cst_5 : f32 to vector<128x128xf32>
    %7 = arith.maximumf %5, %6 : vector<128x128xf32>
    %c0_6 = arith.constant 0 : index
    %c0_7 = arith.constant 0 : index
    %c0_8 = arith.constant 0 : index
    %8 = vector.load %arg4[%c0_6, %c0_7, %c0_8] : memref<2x128x128xf32, #tpu.memory_space<vmem>>, vector<1x128x128xf32>
    %9 = vector.shape_cast %8 : vector<1x128x128xf32> to vector<128x128xf32>
    %cst_9 = arith.constant dense<0.000000e+00> : vector<128x128xf32>
    %10 = tpu.matmul %7, %9, %cst_9 {dimension_numbers = #tpu.dot_dimension_numbers<[1], [0], [0], [1], [0, 0, 1, 1], [], []>} : vector<128x128xf32>, vector<128x128xf32>, vector<128x128xf32> -> vector<128x128xf32>
    %c0_10 = arith.constant 0 : index
    %c0_11 = arith.constant 0 : index
    %c0_12 = arith.constant 0 : index
    %11 = vector.load %arg5[%c0_10, %c0_11, %c0_12] : memref<2x1x128xf32, #tpu.memory_space<vmem>>, vector<1x1x128xf32>
    %12 = vector.shape_cast %11 : vector<1x1x128xf32> to vector<1x128xf32>
    %13 = vector.broadcast %12 : vector<1x128xf32> to vector<128x128xf32>
    %14 = arith.addf %10, %13 : vector<128x128xf32>
    %cst_13 = arith.constant 0.000000e+00 : f32
    %15 = vector.broadcast %cst_13 : f32 to vector<128x128xf32>
    %16 = arith.maximumf %14, %15 : vector<128x128xf32>
    %c1 = arith.constant 1 : index
    %c0_14 = arith.constant 0 : index
    %c0_15 = arith.constant 0 : index
    %17 = vector.load %arg4[%c1, %c0_14, %c0_15] : memref<2x128x128xf32, #tpu.memory_space<vmem>>, vector<1x128x128xf32>
    %18 = vector.shape_cast %17 : vector<1x128x128xf32> to vector<128x128xf32>
    %cst_16 = arith.constant dense<0.000000e+00> : vector<128x128xf32>
    %19 = tpu.matmul %16, %18, %cst_16 {dimension_numbers = #tpu.dot_dimension_numbers<[1], [0], [0], [1], [0, 0, 1, 1], [], []>} : vector<128x128xf32>, vector<128x128xf32>, vector<128x128xf32> -> vector<128x128xf32>
    %c1_17 = arith.constant 1 : index
    %c0_18 = arith.constant 0 : index
    %c0_19 = arith.constant 0 : index
    %20 = vector.load %arg5[%c1_17, %c0_18, %c0_19] : memref<2x1x128xf32, #tpu.memory_space<vmem>>, vector<1x1x128xf32>
    %21 = vector.shape_cast %20 : vector<1x1x128xf32> to vector<1x128xf32>
    %22 = vector.broadcast %21 : vector<1x128xf32> to vector<128x128xf32>
    %23 = arith.addf %19, %22 : vector<128x128xf32>
    %cst_20 = arith.constant 0.000000e+00 : f32
    %24 = vector.broadcast %cst_20 : f32 to vector<128x128xf32>
    %25 = arith.maximumf %23, %24 : vector<128x128xf32>
    %c0_21 = arith.constant 0 : index
    %c0_22 = arith.constant 0 : index
    %26 = vector.load %arg6[%c0_21, %c0_22] : memref<1x128xf32, #tpu.memory_space<vmem>>, vector<1x128xf32>
    %cst_23 = arith.constant dense<0.000000e+00> : vector<1x128xf32>
    %27 = tpu.matmul %26, %25, %cst_23 {dimension_numbers = #tpu.dot_dimension_numbers<[1], [1], [0], [0], [0, 0, 1, 0], [], []>} : vector<1x128xf32>, vector<128x128xf32>, vector<1x128xf32> -> vector<1x128xf32>
    %28 = vector.shape_cast %27 : vector<1x128xf32> to vector<1x1x128xf32>
    %c0_24 = arith.constant 0 : index
    %c0_25 = arith.constant 0 : index
    %29 = vector.load %arg7[%c0_24, %c0_25] : memref<1x1xf32, #tpu.memory_space<vmem>>, vector<1x1xf32>
    %30 = vector.shape_cast %29 : vector<1x1xf32> to vector<1x1x1xf32>
    %31 = vector.broadcast %30 : vector<1x1x1xf32> to vector<1x1x128xf32>
    %32 = arith.addf %28, %31 : vector<1x1x128xf32>
    %c0_26 = arith.constant 0 : index
    %c0_27 = arith.constant 0 : index
    %c0_28 = arith.constant 0 : index
    %33 = vector.load %arg8[%c0_26, %c0_27, %c0_28] : memref<1x1x128xf32, #tpu.memory_space<vmem>>, vector<1x1x128xf32>
    tpu.vector_store %arg8[%c0_26, %c0_27, %c0_28], %32 {strides = array<i32>} : memref<1x1x128xf32, #tpu.memory_space<vmem>>, vector<1x1x128xf32>,
    return
  }
  func.func @transform_0(%arg0: i32) -> (i32, i32) {
    %c0_i32 = arith.constant 0 : i32
    %c0_i32_0 = arith.constant 0 : i32
    return %arg0, %c0_i32 : i32, i32
  }
  func.func @transform_1(%arg0: i32) -> (i32, i32) {
    %c0_i32 = arith.constant 0 : i32
    %c0_i32_0 = arith.constant 0 : i32
    %c0_i32_1 = arith.constant 0 : i32
    return %c0_i32, %c0_i32_0 : i32, i32
  }
  func.func @transform_2(%arg0: i32) -> (i32, i32) {
    %c0_i32 = arith.constant 0 : i32
    %c0_i32_0 = arith.constant 0 : i32
    %c0_i32_1 = arith.constant 0 : i32
    return %c0_i32, %c0_i32_0 : i32, i32
  }
  func.func @transform_3(%arg0: i32) -> (i32, i32, i32) {
    %c0_i32 = arith.constant 0 : i32
    %c0_i32_0 = arith.constant 0 : i32
    %c0_i32_1 = arith.constant 0 : i32
    %c0_i32_2 = arith.constant 0 : i32
    return %c0_i32, %c0_i32_0, %c0_i32_1 : i32, i32, i32
  }
  func.func @transform_4(%arg0: i32) -> (i32, i32, i32) {
    %c0_i32 = arith.constant 0 : i32
    %c0_i32_0 = arith.constant 0 : i32
    %c0_i32_1 = arith.constant 0 : i32
    %c0_i32_2 = arith.constant 0 : i32
    return %c0_i32, %c0_i32_0, %c0_i32_1 : i32, i32, i32
  }
  func.func @transform_5(%arg0: i32) -> (i32, i32) {
    %c0_i32 = arith.constant 0 : i32
    %c0_i32_0 = arith.constant 0 : i32
    %c0_i32_1 = arith.constant 0 : i32
    return %c0_i32, %c0_i32_0 : i32, i32
  }
  func.func @transform_6(%arg0: i32) -> (i32, i32) {
    %c0_i32 = arith.constant 0 : i32
    %c0_i32_0 = arith.constant 0 : i32
    %c0_i32_1 = arith.constant 0 : i32
    return %c0_i32, %c0_i32_0 : i32, i32
  }
  func.func @transform_7(%arg0: i32) -> (i32, i32, i32) {
    %c0_i32 = arith.constant 0 : i32
    %c0_i32_0 = arith.constant 0 : i32
    %c0_i32_1 = arith.constant 0 : i32
    return %arg0, %c0_i32, %c0_i32_0 : i32, i32, i32
  }
}

</mosaic_0001>

<bundles_post_ra>
// kernel: tpu_custom_call.1
= control target key start
LH: loop header
LB: loop body
LE: loop exit
PB: predicated region body
PF: predicated region fallthrough
CT: control target
= control target key end

     0   :  { %s1257_s0 = inlined_call_operand.hbm [shape: f32[128,128], index: 0, kind: input, shape index: {}]   ;;  %s1258_s1 = inlined_call_operand.hbm [shape: f32[128,128], index: 1, kind: input, shape index: {}]   ;;  %s1259_s2 = inlined_call_operand.vmem [shape: f32[1,128], index: 2, kind: input, shape index: {}]   ;;  %s1260_s3 = inlined_call_operand.hbm [shape: f32[2,128,128], index: 3, kind: input, shape index: {}]   ;;  %s1261_s4 = inlined_call_operand.vmem [shape: f32[2,1,128], index: 4, kind: input, shape index: {}]   ;;  %s1262_s5 = inlined_call_operand.vmem [shape: f32[1,128], index: 5, kind: input, shape index: {}]   ;;  %s1263_s6 = inlined_call_operand.<no memory space> [shape: f32[1,1], index: 6, kind: input, shape index: {}]   ;;  %s1264_s7 = inlined_call_operand.hbm [shape: f32[1,1,128], index: 7, kind: output, shape index: {}]  }
   0x1   :  { %v12_v0 = vstv %s1263_s6 }
   0x2   :  { %13 = vst [vmem:[#allocation2] sm:$0x1] %v12_v0 }
   0x3   :  { %14 = vsyncpa [#allocation4], 0 }
   0x4   :  { %15 = vsyncpa [#allocation7], 0 }
   0x5   :  { %16 = vsyncpa [#allocation5], 0  ;;  %s1155_s26 = smov [#allocation6]   ;;  %s1156_s28 = smov [#allocation3]  }
   0x6   :  { %s34_s27 = sshll.u32 %s1155_s26, 4  ;;  %s22_s29 = sshll.u32 %s1156_s28, 4  ;;  %s35_s27 = int_to_ptr.vmem [resolvable:$true] %s34_s27  ;;  %s23_s29 = int_to_ptr.vmem [resolvable:$true] %s22_s29 }
   0x7   :  { %s1077_s30 = scalar_lea.vmem %s35_s27, 2048  ;;  %p1082_p1 = scmp.lt.s32.totalorder %s35_s27, %s35_s27 }
   0x8   :  { %p1078_p0 = scmp.ne.s32.totalorder %s35_s27, %s1077_s30  ;;  %p1083_p2 = scmp.lt.s32.totalorder %s1077_s30, %s1077_s30 }
   0xa   :  { %p1084_p3 = por %p1083_p2, %p1082_p1 }
   0xc   :  { %p1085_p4 = pnand %p1084_p3, %p1078_p0 }
   0xe   :  { %1088 = shalt.err (!%p1085_p4)
}
   0xf   :  { %s1157_s8 = smov 128   ;;  %s1158_s9 = smov 8  }
  0x10   :  { %40 = dma.hbm_to_vmem [thread:$0]  %s1258_s1, 2048, %s35_s27, [#allocation7], %s1157_s8, %s1157_s8, %s1158_s9  }
  0x11   :  { %s1097_s11 = scalar_lea.vmem %s23_s29, 2048  ;;  %p1102_p6 = scmp.lt.s32.totalorder %s23_s29, %s23_s29 }
  0x12   :  { %p1098_p5 = scmp.ne.s32.totalorder %s23_s29, %s1097_s11  ;;  %p1103_p7 = scmp.lt.s32.totalorder %s1097_s11, %s1097_s11 }
  0x14   :  { %p1104_p8 = por %p1103_p7, %p1102_p6 }
  0x16   :  { %p1105_p9 = pnand %p1104_p8, %p1098_p5 }
  0x18   :  { %1108 = shalt.err (!%p1105_p9)
}
  0x19   :  { %28 = dma.hbm_to_vmem [thread:$0]  %s1257_s0, 2048, %s23_s29, [#allocation4], %s1157_s8, %s1157_s8, %s1158_s9  }
  0x1a   :  { %s1159_s14 = smov [#allocation8]  }
  0x1b   :  { %s48_s15 = sshll.u32 %s1159_s14, 4  ;;  %s49_s15 = int_to_ptr.vmem [resolvable:$true] %s48_s15 }
  0x1c   :  { %s1117_s16 = scalar_lea.vmem %s49_s15, 4096  ;;  %p1122_p11 = scmp.lt.s32.totalorder %s49_s15, %s49_s15 }
  0x1d   :  { %p1118_p10 = scmp.ne.s32.totalorder %s49_s15, %s1117_s16  ;;  %p1123_p12 = scmp.lt.s32.totalorder %s1117_s16, %s1117_s16 }
  0x1f   :  { %p1124_p13 = por %p1123_p12, %p1122_p11 }
  0x21   :  { %p1125_p0 = pnand %p1124_p13, %p1118_p10 }
  0x23   :  { %1128 = shalt.err (!%p1125_p0)
}
  0x24   :  { %54 = dma.hbm_to_vmem [thread:$0]  %s1260_s3, 4096, %s49_s15, [#allocation7], %s1157_s8, %s1157_s8, %s1158_s9  }
  0x25   :  { %1149 = dma.done.wait [#allocation4], 2048  }
  0x26   :  { %1150 = vsyncadd [#allocation4], 4294965248 }
  0x27   :  { %1151 = dma.done.wait [#allocation7], 6144  }
  0x28   :  { %1152 = vsyncadd [#allocation7], 4294961152  ;;  %v101_v1 = vld [vmem:[#allocation6 + $0x78] sm:$0xff]  ;;  %v100_v2 = vld [vmem:[#allocation6 + $0x70] sm:$0xff]  ;;  %vm1161_vm0 = vmmov 0   ;;  %s1163_s22 = smov [#allocation9]  }
  0x29   :  { %856 = vmatprep.subr.mxu0 %v101_v1  ;;  %v99_v3 = vld [vmem:[#allocation6 + $0x68] sm:$0xff]  ;;  %v98_v4 = vld [vmem:[#allocation6 + $0x60] sm:$0xff]  ;;  %v97_v6 = vld [vmem:[#allocation6 + $0x58] sm:$0xff]  ;;  %s729_s23 = sshll.u32 %s1163_s22, 4  ;;  %s730_s23 = int_to_ptr.vmem [resolvable:$true] %s729_s23 }
  0x2a   :  { %857 = vmatpush3.msra.mxu0 %v101_v1  ;;  %v70_v5 = vld [vmem:[#allocation3] sm:$0xff]  ;;  %v96_v7 = vld [vmem:[#allocation6 + $0x50] sm:$0xff]  ;;  %v95_v8 = vld [vmem:[#allocation6 + $0x48] sm:$0xff]  ;;  %s1129_s24 = scalar_lea.vmem %s730_s23, 16  ;;  %s1133_s25 = scalar_lea.vmem %s730_s23, 32 }
  0x2b   :  { %858 = vmatprep.subr.mxu0 %v100_v2  ;;  %888 = vmatprep.mubr.f32.mxu0 %v70_v5  ;;  %v285_v9 = vld [vmem:[#allocation8 + $0x78] sm:$0xff]  ;;  %v284_v10 = vld [vmem:[#allocation8 + $0x70] sm:$0xff]  ;;  %v94_v11 = vld [vmem:[#allocation6 + $0x40] sm:$0xff]  ;;  %p1130_p1 = scmp.ne.s32.totalorder %s730_s23, %s1129_s24  ;;  %p1134_p2 = scmp.lt.s32.totalorder %s730_s23, %s730_s23 }
  0x2c   :  { %859 = vmatpush3.msra.mxu0 %v100_v2  ;;  %912 = vmatprep.subr.mxu1 %v285_v9  ;;  %v283_v12 = vld [vmem:[#allocation8 + $0x68] sm:$0xff]  ;;  %v93_v13 = vld [vmem:[#allocation6 + $0x38] sm:$0xff]  ;;  %v282_v14 = vld [vmem:[#allocation8 + $0x60] sm:$0xff]  ;;  %p1135_p3 = scmp.lt.s32.totalorder %s1133_s25, %s1129_s24 }
  0x2d   :  { %860 = vmatprep.subr.mxu0 %v99_v3  ;;  %913 = vmatpush3.msra.mxu1 %v285_v9  ;;  %v92_v15 = vld [vmem:[#allocation6 + $0x30] sm:$0xff]  ;;  %v281_v16 = vld [vmem:[#allocation8 + $0x58] sm:$0xff]  ;;  %v91_v17 = vld [vmem:[#allocation6 + $0x28] sm:$0xff] }
  0x2e   :  { %861 = vmatpush3.msra.mxu0 %v99_v3  ;;  %914 = vmatprep.subr.mxu1 %v284_v10  ;;  %v280_v18 = vld [vmem:[#allocation8 + $0x50] sm:$0xff]  ;;  %v90_v19 = vld [vmem:[#allocation6 + $0x20] sm:$0xff]  ;;  %v279_v20 = vld [vmem:[#allocation8 + $0x48] sm:$0xff]  ;;  %p1136_p4 = por %p1135_p3, %p1134_p2 }
  0x2f   :  { %862 = vmatprep.subr.mxu0 %v98_v4  ;;  %915 = vmatpush3.msra.mxu1 %v284_v10  ;;  %v89_v21 = vld [vmem:[#allocation6 + $0x18] sm:$0xff]  ;;  %v278_v22 = vld [vmem:[#allocation8 + $0x40] sm:$0xff]  ;;  %v88_v23 = vld [vmem:[#allocation6 + $0x10] sm:$0xff] }
  0x30   :  { %863 = vmatpush3.msra.mxu0 %v98_v4  ;;  %916 = vmatprep.subr.mxu1 %v283_v12  ;;  %v277_v24 = vld [vmem:[#allocation8 + $0x38] sm:$0xff]  ;;  %v87_v25 = vld [vmem:[#allocation6 + $0x8] sm:$0xff]  ;;  %v276_v26 = vld [vmem:[#allocation8 + $0x30] sm:$0xff]  ;;  %p1137_p5 = pnand %p1136_p4, %p1130_p1 }
  0x31   :  { %864 = vmatprep.subr.mxu0 %v97_v6  ;;  %917 = vmatpush3.msra.mxu1 %v283_v12  ;;  %v86_v27 = vld [vmem:[#allocation6] sm:$0xff]  ;;  %v275_v28 = vld [vmem:[#allocation8 + $0x28] sm:$0xff]  ;;  %v72_v31 = vld [vmem:[#allocation3 + $0x10] sm:$0xff] }
  0x32   :  { %865 = vmatpush3.msra.mxu0 %v97_v6  ;;  %918 = vmatprep.subr.mxu1 %v282_v14  ;;  %v71_v29 = vld [vmem:[#allocation3 + $0x8] sm:$0xff]  ;;  %v274_v30 = vld [vmem:[#allocation8 + $0x20] sm:$0xff]  ;;  %v73_v32 = vld [vmem:[#allocation3 + $0x18] sm:$0xff] }
  0x33   :  { %866 = vmatprep.subr.mxu0 %v96_v7  ;;  %919 = vmatpush3.msra.mxu1 %v282_v14  ;;  %v74_v33 = vld [vmem:[#allocation3 + $0x20] sm:$0xff]  ;;  %v75_v34 = vld [vmem:[#allocation3 + $0x28] sm:$0xff]  ;;  %v76_v35 = vld [vmem:[#allocation3 + $0x30] sm:$0xff] }
  0x34   :  { %867 = vmatpush3.msra.mxu0 %v96_v7  ;;  %920 = vmatprep.subr.mxu1 %v281_v16  ;;  %v77_v36 = vld [vmem:[#allocation3 + $0x38] sm:$0xff]  ;;  %v78_v37 = vld [vmem:[#allocation3 + $0x40] sm:$0xff]  ;;  %v79_v38 = vld [vmem:[#allocation3 + $0x48] sm:$0xff] }
  0x35   :  { %868 = vmatprep.subr.mxu0 %v95_v8  ;;  %921 = vmatpush3.msra.mxu1 %v281_v16  ;;  %v80_v39 = vld [vmem:[#allocation3 + $0x50] sm:$0xff]  ;;  %v81_v40 = vld [vmem:[#allocation3 + $0x58] sm:$0xff]  ;;  %v82_v41 = vld [vmem:[#allocation3 + $0x60] sm:$0xff] }
  0x36   :  { %869 = vmatpush3.msra.mxu0 %v95_v8  ;;  %922 = vmatprep.subr.mxu1 %v280_v18  ;;  %v83_v42 = vld [vmem:[#allocation3 + $0x68] sm:$0xff]  ;;  %v84_v43 = vld [vmem:[#allocation3 + $0x70] sm:$0xff]  ;;  %v85_v44 = vld [vmem:[#allocation3 + $0x78] sm:$0xff] }
  0x37   :  { %870 = vmatprep.subr.mxu0 %v94_v11  ;;  %923 = vmatpush3.msra.mxu1 %v280_v18  ;;  %v273_v45 = vld [vmem:[#allocation8 + $0x18] sm:$0xff]  ;;  %v272_v46 = vld [vmem:[#allocation8 + $0x10] sm:$0xff]  ;;  %v271_v47 = vld [vmem:[#allocation8 + $0x8] sm:$0xff] }
  0x38   :  { %871 = vmatpush3.msra.mxu0 %v94_v11  ;;  %924 = vmatprep.subr.mxu1 %v279_v20  ;;  %v270_v48 = vld [vmem:[#allocation8] sm:$0xff]  ;;  %v470_v49 = vld [vmem:[#allocation8 + $0xf8] sm:$0xff]  ;;  %v469_v50 = vld [vmem:[#allocation8 + $0xf0] sm:$0xff] }
  0x39   :  { %872 = vmatprep.subr.mxu0 %v93_v13  ;;  %925 = vmatpush3.msra.mxu1 %v279_v20  ;;  %v468_v51 = vld [vmem:[#allocation8 + $0xe8] sm:$0xff]  ;;  %v467_v52 = vld [vmem:[#allocation8 + $0xe0] sm:$0xff]  ;;  %v466_v53 = vld [vmem:[#allocation8 + $0xd8] sm:$0xff] }
  0x3a   :  { %873 = vmatpush3.msra.mxu0 %v93_v13  ;;  %926 = vmatprep.subr.mxu1 %v278_v22  ;;  %v465_v54 = vld [vmem:[#allocation8 + $0xd0] sm:$0xff]  ;;  %v464_v55 = vld [vmem:[#allocation8 + $0xc8] sm:$0xff]  ;;  %v463_v56 = vld [vmem:[#allocation8 + $0xc0] sm:$0xff] }
  0x3b   :  { %874 = vmatprep.subr.mxu0 %v92_v15  ;;  %927 = vmatpush3.msra.mxu1 %v278_v22  ;;  %v462_v57 = vld [vmem:[#allocation8 + $0xb8] sm:$0xff]  ;;  %v461_v58 = vld [vmem:[#allocation8 + $0xb0] sm:$0xff]  ;;  %v460_v59 = vld [vmem:[#allocation8 + $0xa8] sm:$0xff] }
  0x3c   :  { %875 = vmatpush3.msra.mxu0 %v92_v15  ;;  %928 = vmatprep.subr.mxu1 %v277_v24  ;;  %v459_v60 = vld [vmem:[#allocation8 + $0xa0] sm:$0xff]  ;;  %v458_v61 = vld [vmem:[#allocation8 + $0x98] sm:$0xff] }
  0x3d   :  { %876 = vmatprep.subr.mxu0 %v91_v17  ;;  %929 = vmatpush3.msra.mxu1 %v277_v24  ;;  %v739_v62 = vld [vmem:[%s1259_s2] ss:$0 sm:$0xff] }
  0x3e   :  { %877 = vmatpush3.msra.mxu0 %v91_v17  ;;  %930 = vmatprep.subr.mxu1 %v276_v26 }
  0x3f   :  { %878 = vmatprep.subr.mxu0 %v90_v19  ;;  %931 = vmatpush3.msra.mxu1 %v276_v26 }
  0x40   :  { %879 = vmatpush3.msra.mxu0 %v90_v19  ;;  %932 = vmatprep.subr.mxu1 %v275_v28 }
  0x41   :  { %880 = vmatprep.subr.mxu0 %v89_v21  ;;  %933 = vmatpush3.msra.mxu1 %v275_v28 }
  0x42   :  { %881 = vmatpush3.msra.mxu0 %v89_v21  ;;  %934 = vmatprep.subr.mxu1 %v274_v30 }
  0x43   :  { %882 = vmatprep.subr.mxu0 %v88_v23  ;;  %935 = vmatpush3.msra.mxu1 %v274_v30 }
  0x44   :  { %883 = vmatpush3.msra.mxu0 %v88_v23  ;;  %936 = vmatprep.subr.mxu1 %v273_v45 }
  0x45   :  { %884 = vmatprep.subr.mxu0 %v87_v25  ;;  %937 = vmatpush3.msra.mxu1 %v273_v45 }
  0x46   :  { %885 = vmatpush3.msra.mxu0 %v87_v25  ;;  %938 = vmatprep.subr.mxu1 %v272_v46 }
  0x47   :  { %886 = vmatprep.subr.mxu0 %v86_v27  ;;  %939 = vmatpush3.msra.mxu1 %v272_v46 }
  0x48   :  { %887 = vmatpush3.msra.mxu0 %v86_v27  ;;  %940 = vmatprep.subr.mxu1 %v271_v47 }
  0x49   :  { %889 = vmatmul.mubr.f32.vlgmr.msra.gmra.mxu0 %v71_v29  ;;  %941 = vmatpush3.msra.mxu1 %v271_v47  ;;  %v457_v47 = vld [vmem:[#allocation8 + $0x90] sm:$0xff] }
  0x4a   :  { %891 = vmatprep.mubr.f32.mxu0 %v72_v31  ;;  %942 = vmatprep.subr.mxu1 %v270_v48 }
  0x4b   :  { %943 = vmatpush3.msra.mxu1 %v270_v48  ;;  %968 = vmatprep.subr.mxu0 %v470_v49  ;;  %v456_v48 = vld [vmem:[#allocation8 + $0x88] sm:$0xff] }
  0x4c   :  { %969 = vmatpush3.msra.mxu0 %v470_v49  ;;  %v455_v49 = vld [vmem:[#allocation8 + $0x80] sm:$0xff] }
  0x4d   :  { %892 = vmatmul.mubr.f32.gmra.mxu0 %v73_v32  ;;  %970 = vmatprep.subr.mxu0 %v469_v50 }
  0x4e   :  { %894 = vmatprep.mubr.f32.mxu0 %v74_v33  ;;  %971 = vmatpush3.msra.mxu0 %v469_v50  ;;  %v740_v50 = vld [vmem:[%s1261_s4] ss:$0 sm:$0xff] }
  0x4f   :  { %972 = vmatprep.subr.mxu0 %v468_v51 }
  0x50   :  { %973 = vmatpush3.msra.mxu0 %v468_v51 }
  0x51   :  { %895 = vmatmul.mubr.f32.gmra.mxu0 %v75_v34  ;;  %974 = vmatprep.subr.mxu0 %v467_v52 }
  0x52   :  { %897 = vmatprep.mubr.f32.mxu0 %v76_v35  ;;  %975 = vmatpush3.msra.mxu0 %v467_v52 }
  0x53   :  { %976 = vmatprep.subr.mxu0 %v466_v53 }
  0x54   :  { %977 = vmatpush3.msra.mxu0 %v466_v53 }
  0x55   :  { %898 = vmatmul.mubr.f32.gmra.mxu0 %v77_v36  ;;  %978 = vmatprep.subr.mxu0 %v465_v54 }
  0x56   :  { %900 = vmatprep.mubr.f32.mxu0 %v78_v37  ;;  %979 = vmatpush3.msra.mxu0 %v465_v54 }
  0x57   :  { %980 = vmatprep.subr.mxu0 %v464_v55 }
  0x58   :  { %981 = vmatpush3.msra.mxu0 %v464_v55 }
  0x59   :  { %901 = vmatmul.mubr.f32.gmra.mxu0 %v79_v38  ;;  %982 = vmatprep.subr.mxu0 %v463_v56 }
  0x5a   :  { %903 = vmatprep.mubr.f32.mxu0 %v80_v39  ;;  %983 = vmatpush3.msra.mxu0 %v463_v56 }
  0x5b   :  { %984 = vmatprep.subr.mxu0 %v462_v57 }
  0x5c   :  { %985 = vmatpush3.msra.mxu0 %v462_v57 }
  0x5d   :  { %904 = vmatmul.mubr.f32.gmra.mxu0 %v81_v40  ;;  %986 = vmatprep.subr.mxu0 %v461_v58 }
  0x5e   :  { %906 = vmatprep.mubr.f32.mxu0 %v82_v41  ;;  %987 = vmatpush3.msra.mxu0 %v461_v58 }
  0x5f   :  { %988 = vmatprep.subr.mxu0 %v460_v59 }
  0x60   :  { %989 = vmatpush3.msra.mxu0 %v460_v59 }
  0x61   :  { %907 = vmatmul.mubr.f32.gmra.mxu0 %v83_v42  ;;  %990 = vmatprep.subr.mxu0 %v459_v60 }
  0x62   :  { %909 = vmatprep.mubr.f32.mxu0 %v84_v43  ;;  %991 = vmatpush3.msra.mxu0 %v459_v60 }
  0x63   :  { %992 = vmatprep.subr.mxu0 %v458_v61 }
  0x64   :  { %993 = vmatpush3.msra.mxu0 %v458_v61 }
  0x65   :  { %910 = vmatmul.mubr.f32.gmra.mxu0 %v85_v44  ;;  %994 = vmatprep.subr.mxu0 %v457_v47 }
  0x66   :  { %995 = vmatpush3.msra.mxu0 %v457_v47 }
  0x67   :  { %996 = vmatprep.subr.mxu0 %v456_v48 }
  0x68   :  { %997 = vmatpush3.msra.mxu0 %v456_v48 }
  0x69   :  { %998 = vmatprep.subr.mxu0 %v455_v49 }
  0x6a   :  { %999 = vmatpush3.msra.mxu0 %v455_v49 }
 0x109   :  { %v890_v63 = vpop.f32.mrf.mxu0 }
 0x10a   :  { %v181_v0 = vadd.f32 %v890_v63, %v739_v62 }
 0x10b   :  { %v175_v1 = vpop.f32.mrf.mxu0 }
 0x10c   :  { %v176_v2 = vadd.f32 %v739_v62, %v175_v1  ;;  %v255_v5 = vmax.f32 %v181_v0, 0.0 }
 0x10d   :  { %v893_v3 = vpop.f32.mrf.mxu0 }
 0x10e   :  { %v254_v4 = vmax.f32 %v176_v2, 0.0  ;;  %v191_v6 = vadd.f32 %v893_v3, %v739_v62 }
 0x10f   :  { %v185_v7 = vpop.f32.mrf.mxu0 }
 0x110   :  { %v186_v8 = vadd.f32 %v739_v62, %v185_v7  ;;  %944 = vmatprep.mubr.f32.mxu1 %v254_v4  ;;  %v257_v11 = vmax.f32 %v191_v6, 0.0 }
 0x111   :  { %v896_v9 = vpop.f32.mrf.mxu0  ;;  %945 = vmatmul.mubr.f32.vlgmr.msra.gmra.mxu1 %v255_v5 }
 0x112   :  { %v256_v10 = vmax.f32 %v186_v8, 0.0  ;;  %v201_v12 = vadd.f32 %v896_v9, %v739_v62 }
 0x113   :  { %v195_v13 = vpop.f32.mrf.mxu0 }
 0x114   :  { %v196_v14 = vadd.f32 %v739_v62, %v195_v13  ;;  %947 = vmatprep.mubr.f32.mxu1 %v256_v10  ;;  %v259_v17 = vmax.f32 %v201_v12, 0.0 }
 0x115   :  { %v899_v15 = vpop.f32.mrf.mxu0  ;;  %948 = vmatmul.mubr.f32.gmra.mxu1 %v257_v11 }
 0x116   :  { %v258_v16 = vmax.f32 %v196_v14, 0.0  ;;  %v211_v18 = vadd.f32 %v899_v15, %v739_v62 }
 0x117   :  { %v205_v19 = vpop.f32.mrf.mxu0 }
 0x118   :  { %v206_v20 = vadd.f32 %v739_v62, %v205_v19  ;;  %950 = vmatprep.mubr.f32.mxu1 %v258_v16  ;;  %v261_v23 = vmax.f32 %v211_v18, 0.0 }
 0x119   :  { %v902_v21 = vpop.f32.mrf.mxu0  ;;  %951 = vmatmul.mubr.f32.gmra.mxu1 %v259_v17 }
 0x11a   :  { %v260_v22 = vmax.f32 %v206_v20, 0.0  ;;  %v221_v24 = vadd.f32 %v902_v21, %v739_v62 }
 0x11b   :  { %v215_v25 = vpop.f32.mrf.mxu0 }
 0x11c   :  { %v216_v26 = vadd.f32 %v739_v62, %v215_v25  ;;  %953 = vmatprep.mubr.f32.mxu1 %v260_v22  ;;  %v263_v29 = vmax.f32 %v221_v24, 0.0 }
 0x11d   :  { %v905_v27 = vpop.f32.mrf.mxu0  ;;  %954 = vmatmul.mubr.f32.gmra.mxu1 %v261_v23 }
 0x11e   :  { %v262_v28 = vmax.f32 %v216_v26, 0.0  ;;  %v231_v30 = vadd.f32 %v905_v27, %v739_v62 }
 0x11f   :  { %v225_v31 = vpop.f32.mrf.mxu0 }
 0x120   :  { %v226_v32 = vadd.f32 %v739_v62, %v225_v31  ;;  %956 = vmatprep.mubr.f32.mxu1 %v262_v28  ;;  %v265_v35 = vmax.f32 %v231_v30, 0.0 }
 0x121   :  { %v908_v33 = vpop.f32.mrf.mxu0  ;;  %957 = vmatmul.mubr.f32.gmra.mxu1 %v263_v29 }
 0x122   :  { %v264_v34 = vmax.f32 %v226_v32, 0.0  ;;  %v241_v36 = vadd.f32 %v908_v33, %v739_v62 }
 0x123   :  { %v235_v37 = vpop.f32.mrf.mxu0 }
 0x124   :  { %v236_v38 = vadd.f32 %v739_v62, %v235_v37  ;;  %959 = vmatprep.mubr.f32.mxu1 %v264_v34  ;;  %v267_v41 = vmax.f32 %v241_v36, 0.0  ;;  %v711_v36 = vld [vmem:[#allocation2] sm:$0x1]  ;;  %v1162_v37 = vmov 0  }
 0x125   :  { %v911_v39 = vpop.f32.mrf.mxu0  ;;  %960 = vmatmul.mubr.f32.gmra.mxu1 %v265_v35  ;;  %v1160_v35 = vmov 0.0   ;;  %1068 = vset.pattern.permute.xlu0 %v1162_v37 }
 0x126   :  { %v266_v40 = vmax.f32 %v236_v38, 0.0  ;;  %v251_v42 = vadd.f32 %v911_v39, %v739_v62  ;;  %1024 = vmatprep.subr.mxu1 %v1160_v35  ;;  %714 = vperm.xlu0 %1068, %v711_v36  }
 0x127   :  { %v245_v43 = vpop.f32.mrf.mxu0 }
 0x128   :  { %v246_v44 = vadd.f32 %v739_v62, %v245_v43  ;;  %962 = vmatprep.mubr.f32.mxu1 %v266_v40  ;;  %v269_v46 = vmax.f32 %v251_v42, 0.0 }
 0x129   :  { %963 = vmatmul.mubr.f32.gmra.mxu1 %v267_v41 }
 0x12a   :  { %v268_v45 = vmax.f32 %v246_v44, 0.0 }
 0x12c   :  { %965 = vmatprep.mubr.f32.mxu1 %v268_v45 }
 0x12d   :  { %966 = vmatmul.mubr.f32.gmra.mxu1 %v269_v46 }
 0x12e   :  { %1056 = vmatprep.mubr.msk.f32.mxu1 %vm1161_vm0, %v1160_v35 }
 0x1d1   :  { %v946_v51 = vpop.f32.mrf.mxu1 }
 0x1d2   :  { %v365_v52 = vadd.f32 %v946_v51, %v740_v50 }
 0x1d3   :  { %v359_v53 = vpop.f32.mrf.mxu1 }
 0x1d4   :  { %v360_v54 = vadd.f32 %v740_v50, %v359_v53  ;;  %v439_v57 = vmax.f32 %v365_v52, 0.0  ;;  %v742_v52 = vld [vmem:[%s1261_s4 + $0x1] ss:$0 sm:$0xff] }
 0x1d5   :  { %v949_v55 = vpop.f32.mrf.mxu1 }
 0x1d6   :  { %v438_v56 = vmax.f32 %v360_v54, 0.0  ;;  %v375_v58 = vadd.f32 %v949_v55, %v740_v50 }
 0x1d7   :  { %v369_v59 = vpop.f32.mrf.mxu1 }
 0x1d8   :  { %v370_v60 = vadd.f32 %v740_v50, %v369_v59  ;;  %1000 = vmatprep.mubr.f32.mxu0 %v438_v56  ;;  %v441_v63 = vmax.f32 %v375_v58, 0.0 }
 0x1d9   :  { %v952_v61 = vpop.f32.mrf.mxu1  ;;  %1001 = vmatmul.mubr.f32.vlgmr.msra.gmra.mxu0 %v439_v57 }
 0x1da   :  { %v440_v62 = vmax.f32 %v370_v60, 0.0  ;;  %v385_v0 = vadd.f32 %v952_v61, %v740_v50 }
 0x1db   :  { %v379_v1 = vpop.f32.mrf.mxu1 }
 0x1dc   :  { %v380_v2 = vadd.f32 %v740_v50, %v379_v1  ;;  %1003 = vmatprep.mubr.f32.mxu0 %v440_v62  ;;  %v443_v5 = vmax.f32 %v385_v0, 0.0 }
 0x1dd   :  { %v955_v3 = vpop.f32.mrf.mxu1  ;;  %1004 = vmatmul.mubr.f32.gmra.mxu0 %v441_v63 }
 0x1de   :  { %v442_v4 = vmax.f32 %v380_v2, 0.0  ;;  %v395_v6 = vadd.f32 %v955_v3, %v740_v50 }
 0x1df   :  { %v389_v7 = vpop.f32.mrf.mxu1 }
 0x1e0   :  { %v390_v8 = vadd.f32 %v740_v50, %v389_v7  ;;  %1006 = vmatprep.mubr.f32.mxu0 %v442_v4  ;;  %v445_v11 = vmax.f32 %v395_v6, 0.0 }
 0x1e1   :  { %v958_v9 = vpop.f32.mrf.mxu1  ;;  %1007 = vmatmul.mubr.f32.gmra.mxu0 %v443_v5 }
 0x1e2   :  { %v444_v10 = vmax.f32 %v390_v8, 0.0  ;;  %v405_v12 = vadd.f32 %v958_v9, %v740_v50 }
 0x1e3   :  { %v399_v13 = vpop.f32.mrf.mxu1 }
 0x1e4   :  { %v400_v14 = vadd.f32 %v740_v50, %v399_v13  ;;  %1009 = vmatprep.mubr.f32.mxu0 %v444_v10  ;;  %v447_v17 = vmax.f32 %v405_v12, 0.0 }
 0x1e5   :  { %v961_v15 = vpop.f32.mrf.mxu1  ;;  %1010 = vmatmul.mubr.f32.gmra.mxu0 %v445_v11 }
 0x1e6   :  { %v446_v16 = vmax.f32 %v400_v14, 0.0  ;;  %v415_v18 = vadd.f32 %v961_v15, %v740_v50 }
 0x1e7   :  { %v409_v19 = vpop.f32.mrf.mxu1 }
 0x1e8   :  { %v410_v20 = vadd.f32 %v740_v50, %v409_v19  ;;  %1012 = vmatprep.mubr.f32.mxu0 %v446_v16  ;;  %v449_v23 = vmax.f32 %v415_v18, 0.0 }
 0x1e9   :  { %v964_v21 = vpop.f32.mrf.mxu1  ;;  %1013 = vmatmul.mubr.f32.gmra.mxu0 %v447_v17 }
 0x1ea   :  { %v448_v22 = vmax.f32 %v410_v20, 0.0  ;;  %v425_v24 = vadd.f32 %v964_v21, %v740_v50 }
 0x1eb   :  { %v419_v25 = vpop.f32.mrf.mxu1 }
 0x1ec   :  { %v420_v26 = vadd.f32 %v740_v50, %v419_v25  ;;  %1015 = vmatprep.mubr.f32.mxu0 %v448_v22  ;;  %v451_v29 = vmax.f32 %v425_v24, 0.0  ;;  %v717_v24 = vlaneseq }
 0x1ed   :  { %v967_v27 = vpop.f32.mrf.mxu1  ;;  %1016 = vmatmul.mubr.f32.gmra.mxu0 %v449_v23  ;;  %v640_v23 = vld [vmem:[%s1262_s5] sm:$0x1] }
 0x1ee   :  { %v450_v28 = vmax.f32 %v420_v26, 0.0  ;;  %v435_v30 = vadd.f32 %v967_v27, %v740_v50  ;;  %v718_v25 = vshrl.u32 %v717_v24, 7  ;;  %v715_v27 = vpop.permute.xlu0 %714 }
 0x1ef   :  { %v429_v31 = vpop.f32.mrf.mxu1 }
 0x1f0   :  { %v430_v32 = vadd.f32 %v740_v50, %v429_v31  ;;  %1018 = vmatprep.mubr.f32.mxu0 %v450_v28  ;;  %v453_v34 = vmax.f32 %v435_v30, 0.0  ;;  %v719_v26 = vsub.s32 0, %v718_v25 }
 0x1f1   :  { %1019 = vmatmul.mubr.f32.gmra.mxu0 %v451_v29 }
 0x1f2   :  { %v452_v33 = vmax.f32 %v430_v32, 0.0  ;;  %v720_v28 = vrot.slane %v715_v27, %v719_v26 }
 0x1f4   :  { %1021 = vmatprep.mubr.f32.mxu0 %v452_v33 }
 0x1f5   :  { %1022 = vmatmul.mubr.f32.gmra.mxu0 %v453_v34 }
 0x299   :  { %v1224_v38 = vpop.f32.mrf.mxu0 }
 0x29a   :  { %v551_v18 = vadd.f32 %v1224_v38, %v742_v52 }
 0x29b   :  { %v1226_v39 = vpop.f32.mrf.mxu0 }
 0x29c   :  { %v625_v20 = vmax.f32 %v551_v18, 0.0  ;;  %v546_v21 = vadd.f32 %v742_v52, %v1226_v39 }
 0x29d   :  { %v1005_v40 = vpop.f32.mrf.mxu0 }
 0x29e   :  { %v561_v14 = vadd.f32 %v1005_v40, %v742_v52  ;;  %v624_v22 = vmax.f32 %v546_v21, 0.0 }
 0x29f   :  { %v1228_v41 = vpop.f32.mrf.mxu0 }
 0x2a0   :  { %v627_v16 = vmax.f32 %v561_v14, 0.0  ;;  %v556_v17 = vadd.f32 %v742_v52, %v1228_v41 }
 0x2a1   :  { %v1008_v42 = vpop.f32.mrf.mxu0 }
 0x2a2   :  { %v571_v10 = vadd.f32 %v1008_v42, %v742_v52  ;;  %v626_v19 = vmax.f32 %v556_v17, 0.0 }
 0x2a3   :  { %v565_v43 = vpop.f32.mrf.mxu0 }
 0x2a4   :  { %v629_v12 = vmax.f32 %v571_v10, 0.0  ;;  %v566_v13 = vadd.f32 %v742_v52, %v565_v43 }
 0x2a5   :  { %v1011_v44 = vpop.f32.mrf.mxu0 }
 0x2a6   :  { %v581_v6 = vadd.f32 %v1011_v44, %v742_v52  ;;  %v628_v15 = vmax.f32 %v566_v13, 0.0 }
 0x2a7   :  { %v575_v45 = vpop.f32.mrf.mxu0 }
 0x2a8   :  { %v631_v8 = vmax.f32 %v581_v6, 0.0  ;;  %v576_v9 = vadd.f32 %v742_v52, %v575_v45 }
 0x2a9   :  { %v1014_v46 = vpop.f32.mrf.mxu0 }
 0x2aa   :  { %v591_v2 = vadd.f32 %v1014_v46, %v742_v52  ;;  %v630_v11 = vmax.f32 %v576_v9, 0.0 }
 0x2ab   :  { %v585_v47 = vpop.f32.mrf.mxu0 }
 0x2ac   :  { %v633_v4 = vmax.f32 %v591_v2, 0.0  ;;  %v586_v5 = vadd.f32 %v742_v52, %v585_v47 }
 0x2ad   :  { %v1017_v48 = vpop.f32.mrf.mxu0 }
 0x2ae   :  { %v601_v62 = vadd.f32 %v1017_v48, %v742_v52  ;;  %v632_v7 = vmax.f32 %v586_v5, 0.0 }
 0x2af   :  { %v595_v49 = vpop.f32.mrf.mxu0 }
 0x2b0   :  { %v635_v0 = vmax.f32 %v601_v62, 0.0  ;;  %v596_v1 = vadd.f32 %v742_v52, %v595_v49 }
 0x2b1   :  { %v1020_v50 = vpop.f32.mrf.mxu0 }
 0x2b2   :  { %v611_v58 = vadd.f32 %v1020_v50, %v742_v52  ;;  %v634_v3 = vmax.f32 %v596_v1, 0.0 }
 0x2b3   :  { %v605_v51 = vpop.f32.mrf.mxu0 }
 0x2b4   :  { %v637_v60 = vmax.f32 %v611_v58, 0.0  ;;  %v606_v61 = vadd.f32 %v742_v52, %v605_v51 }
 0x2b5   :  { %v1023_v53 = vpop.f32.mrf.mxu0 }
 0x2b6   :  { %v621_v54 = vadd.f32 %v1023_v53, %v742_v52  ;;  %v636_v63 = vmax.f32 %v606_v61, 0.0 }
 0x2b7   :  { %v615_v55 = vpop.f32.mrf.mxu0 }
 0x2b8   :  { %v639_v56 = vmax.f32 %v621_v54, 0.0  ;;  %v616_v57 = vadd.f32 %v742_v52, %v615_v55 }
 0x2ba   :  { %1025 = vmatpush3.xpose.msra.mxu1 %v639_v56  ;;  %v638_v59 = vmax.f32 %v616_v57, 0.0 }
 0x2bb   :  { %1026 = vmatprep.subr.mxu1 %v1160_v35 }
 0x2be   :  { %1027 = vmatpush3.xpose.msra.mxu1 %v638_v59 }
 0x2bf   :  { %1028 = vmatprep.subr.mxu1 %v1160_v35 }
 0x2c2   :  { %1029 = vmatpush3.xpose.msra.mxu1 %v637_v60 }
 0x2c3   :  { %1030 = vmatprep.subr.mxu1 %v1160_v35 }
 0x2c6   :  { %1031 = vmatpush3.xpose.msra.mxu1 %v636_v63 }
 0x2c7   :  { %1032 = vmatprep.subr.mxu1 %v1160_v35 }
 0x2ca   :  { %1033 = vmatpush3.xpose.msra.mxu1 %v635_v0 }
 0x2cb   :  { %1034 = vmatprep.subr.mxu1 %v1160_v35 }
 0x2ce   :  { %1035 = vmatpush3.xpose.msra.mxu1 %v634_v3 }
 0x2cf   :  { %1036 = vmatprep.subr.mxu1 %v1160_v35 }
 0x2d2   :  { %1037 = vmatpush3.xpose.msra.mxu1 %v633_v4 }
 0x2d3   :  { %1038 = vmatprep.subr.mxu1 %v1160_v35 }
 0x2d6   :  { %1039 = vmatpush3.xpose.msra.mxu1 %v632_v7 }
 0x2d7   :  { %1040 = vmatprep.subr.mxu1 %v1160_v35 }
 0x2da   :  { %1041 = vmatpush3.xpose.msra.mxu1 %v631_v8 }
 0x2db   :  { %1042 = vmatprep.subr.mxu1 %v1160_v35 }
 0x2de   :  { %1043 = vmatpush3.xpose.msra.mxu1 %v630_v11 }
 0x2df   :  { %1044 = vmatprep.subr.mxu1 %v1160_v35 }
 0x2e2   :  { %1045 = vmatpush3.xpose.msra.mxu1 %v629_v12 }
 0x2e3   :  { %1046 = vmatprep.subr.mxu1 %v1160_v35 }
 0x2e6   :  { %1047 = vmatpush3.xpose.msra.mxu1 %v628_v15 }
 0x2e7   :  { %1048 = vmatprep.subr.mxu1 %v1160_v35 }
 0x2ea   :  { %1049 = vmatpush3.xpose.msra.mxu1 %v627_v16 }
 0x2eb   :  { %1050 = vmatprep.subr.mxu1 %v1160_v35 }
 0x2ee   :  { %1051 = vmatpush3.xpose.msra.mxu1 %v626_v19 }
 0x2ef   :  { %1052 = vmatprep.subr.mxu1 %v1160_v35 }
 0x2f2   :  { %1053 = vmatpush3.xpose.msra.mxu1 %v625_v20 }
 0x2f3   :  { %1054 = vmatprep.subr.mxu1 %v1160_v35 }
 0x2f6   :  { %1055 = vmatpush3.xpose.msra.mxu1 %v624_v22 }
 0x2f9   :  { %1057 = vmatmul.mubr.f32.vlgmr.msra.gmra.mxu1 %v640_v23 }
 0x3b9   :  { %v707_v29 = vpop.f32.mrf.mxu1 }
 0x3ba   :  { %v721_v30 = vadd.f32 %v720_v28, %v707_v29 }
 0x3bb   :  { %v1058_v31 = vpop.f32.mrf.mxu1 }
 0x3bc   :  { %722 = vst [vmem:[#allocation9] sm:$0x1] %v721_v30 }
 0x3bd   :  { %1140 = shalt.err (!%p1137_p5)
}
 0x3be   :  { %732 = dma.vmem_to_hbm [thread:$0]  %s730_s23, 16, %s1264_s7, [#allocation5]  }
 0x3bf   :  { %1153 = dma.done.wait [#allocation5], 16  }
 0x3c0   :  { %1154 = vsyncadd [#allocation5], 4294967280 }
 0x3c1   :  { %736 = vsyncpa [#allocation4], 1 }
 0x3c2   :  { %737 = vsyncpa [#allocation7], 1 }
 0x3c3   :  { %738 = vsyncpa [#allocation5], 1 }

</bundles_post_ra>
